<compile_context>
chip_gen: v6e
topology: v6e:2x2x1
jax: 0.10.0
libtpu: 0.0.40
codegen_flags: <defaults>
</compile_context>

<pallas_src>
import jax
import jax.numpy as jnp
from jax.experimental import pallas as pl
from jax.experimental.pallas import tpu as pltpu


def enhancer_kernel(xin_ref, h0_ref, win_ref, bin_ref, whh_ref, bhhn_ref,
                    who_ref, bho_ref, hid_ref, out_ref, h_all):
    B, H = h0_ref.shape
    CB = hid_ref.shape[0]
    C = CB // B
    G = bin_ref.shape[-1] // C          # 128-lane-padded per-cell gate slab width

    # ---- ONE block-diagonal matmul for ALL cells' input-side gate pre-activations.
    # gi_all[:, c*G + g*H : c*G + (g+1)*H] = x_c @ W_ih[c,g] + b_ih[c,g] (+ b_hh[c,g] for r,z)
    gi_all = jnp.dot(xin_ref[...].astype(jnp.float32), win_ref[...],
                     preferred_element_type=jnp.float32) + bin_ref[...]

    # ---- sequential GRU recurrence over cells (PyTorch gate order r, z, n) ----
    h = h0_ref[...].astype(jnp.float32)                                   # (B, H)
    for c in range(C):
        base = c * G
        # one fused hidden-side matmul per cell: (B, H) @ (H, 3H)
        gh = jnp.dot(h, whh_ref[c], preferred_element_type=jnp.float32)   # (B, 3H)
        rz = jax.nn.sigmoid(gi_all[:, base:base + 2 * H] + gh[:, 0:2 * H])
        r = rz[:, 0:H]
        z = rz[:, H:2 * H]
        n = jnp.tanh(gi_all[:, base + 2 * H:base + 3 * H]
                     + r * (gh[:, 2 * H:3 * H] + bhhn_ref[c]))
        h = (1.0 - z) * n + z * h
        h_all[c * B:(c + 1) * B, :] = h            # cheap VMEM scratch stash only

    # ---- single bulk stores after the loop (lane-dense / unmasked where possible) ----
    hid_ref[...] = h_all[...].astype(hid_ref.dtype)                      # (C*B, H)
    y = jnp.tanh(jnp.dot(h_all[...], who_ref[...],
                         preferred_element_type=jnp.float32) + bho_ref[...])
    out_ref[...] = y.astype(out_ref.dtype)                               # (C*B, I)


@jax.jit
def enhancer_forward(current, history, init_hidden, kernel_params):
    """current: (B, C, I); history: unused; init_hidden: (B, H)."""
    del history  # reshaped but never used in the PyTorch forward
    w_in, b_in, w_hh_cat, b_hh_n, w_ho, b_ho = kernel_params
    B, C, I = current.shape
    H = init_hidden.shape[-1]

    x_flat = current.reshape(B, C * I)   # row-major flatten, matches block-diag weight

    vmem = pl.BlockSpec(memory_space=pltpu.MemorySpace.VMEM)
    hiddens_cb, outputs_cb = pl.pallas_call(
        enhancer_kernel,
        out_shape=(
            jax.ShapeDtypeStruct((C * B, H), current.dtype),   # hiddens, cell-major
            jax.ShapeDtypeStruct((C * B, I), current.dtype),   # outputs, cell-major
        ),
        in_specs=[vmem] * 8,
        out_specs=(vmem, vmem),
        scratch_shapes=[pltpu.VMEM((C * B, H), jnp.float32)],
    )(x_flat, init_hidden, w_in, b_in, w_hh_cat, b_hh_n, w_ho, b_ho)

    hiddens = jnp.transpose(hiddens_cb.reshape(C, B, H), (1, 0, 2))   # (B, C, H)
    outputs = jnp.transpose(outputs_cb.reshape(C, B, I), (1, 0, 2))   # (B, C, I)
    return outputs, hiddens


def init_params(key, input_size, num_cells, hidden_size):
    """Deterministic init mirroring the PyTorch module (per-gate weight layout)."""
    keys = jax.random.split(key, 4 * num_cells + 2)
    ortho = jax.nn.initializers.orthogonal()
    xavier = jax.nn.initializers.glorot_uniform()
    bound = 1.0 / jnp.sqrt(hidden_size)
    H, I = hidden_size, input_size

    w_ih, b_ih, w_hh, b_hh = [], [], [], []
    for i in range(num_cells):
        # PyTorch GRUCell: weight_ih (3H, I), weight_hh (3H, H), rows [r; z; n],
        # orthogonal_ init; biases uniform(-1/sqrt(H), 1/sqrt(H)).
        wih = ortho(keys[4 * i + 0], (3 * H, I), jnp.float32)
        whh = ortho(keys[4 * i + 1], (3 * H, H), jnp.float32)
        bih = jax.random.uniform(keys[4 * i + 2], (3 * H,), jnp.float32, -bound, bound)
        bhh = jax.random.uniform(keys[4 * i + 3], (3 * H,), jnp.float32, -bound, bound)
        # Per-gate slabs, pre-transposed for x @ W:  (3, I, H) / (3, H, H).
        w_ih.append(jnp.transpose(wih.reshape(3, H, I), (0, 2, 1)))
        w_hh.append(jnp.transpose(whh.reshape(3, H, H), (0, 2, 1)))
        b_ih.append(bih.reshape(3, H))
        b_hh.append(bhh.reshape(3, H))

    w_ih = jnp.stack(w_ih)      # (C, 3, I, H)
    w_hh = jnp.stack(w_hh)      # (C, 3, H, H)
    b_ih = jnp.stack(b_ih)      # (C, 3, H)
    b_hh = jnp.stack(b_hh)      # (C, 3, H)

    # hidden2output: Linear(H, I) -> weight (I, H), xavier_uniform; pre-transposed (H, I).
    who = xavier(keys[-2], (I, H), jnp.float32)
    bho = jax.random.uniform(keys[-1], (I,), jnp.float32, -bound, bound)
    return (w_ih, b_ih, w_hh, b_hh, who.T, bho)


def prepare_kernel_params(params):
    """One-time repack of the per-gate params into the kernel's fused layout."""
    w_ih, b_ih, w_hh, b_hh, who_t, bho = params
    C, _, I, H = w_ih.shape
    G = ((3 * H + 127) // 128) * 128       # 128-lane-padded per-cell gate slab

    # (C, I, 3H) per-cell input slabs, gate order r,z,n along lanes.
    w_ih_slab = jnp.transpose(w_ih, (0, 2, 1, 3)).reshape(C, I, 3 * H)
    # Fused input-side bias: b_ih for all gates, + b_hh for r,z (they add linearly);
    # b_hh_n must stay inside r * (h @ W_n + b_hh_n).
    b_fused = b_ih.at[:, :2, :].add(b_hh[:, :2, :]).reshape(C, 3 * H)

    w_in = jnp.zeros((C * I, C * G), jnp.float32)
    b_in = jnp.zeros((C * G,), jnp.float32)
    for c in range(C):
        w_in = w_in.at[c * I:(c + 1) * I, c * G:c * G + 3 * H].set(w_ih_slab[c])
        b_in = b_in.at[c * G:c * G + 3 * H].set(b_fused[c])

    w_hh_cat = jnp.transpose(w_hh, (0, 2, 1, 3)).reshape(C, H, 3 * H)   # (C, H, 3H)
    b_hh_n = b_hh[:, 2, :].reshape(C, 1, H)                             # (C, 1, H)

    return (w_in, b_in.reshape(1, C * G), w_hh_cat, b_hh_n,
            who_t, bho.reshape(1, -1))


def enhancer_reference(current, init_hidden, params):
    """Pure-JAX reference of the PyTorch forward for validation."""
    w_ih, b_ih, w_hh, b_hh, w_ho, b_ho = params
    B, C, I = current.shape
    h = init_hidden
    outs, hids = [], []
    for c in range(C):
        x = current[:, c, :]
        r = jax.nn.sigmoid(x @ w_ih[c, 0] + b_ih[c, 0] + h @ w_hh[c, 0] + b_hh[c, 0])
        z = jax.nn.sigmoid(x @ w_ih[c, 1] + b_ih[c, 1] + h @ w_hh[c, 1] + b_hh[c, 1])
        n = jnp.tanh(x @ w_ih[c, 2] + b_ih[c, 2]
                     + r * (h @ w_hh[c, 2] + b_hh[c, 2]))
        h = (1.0 - z) * n + z * h
        hids.append(h)
        outs.append(jnp.tanh(h @ w_ho + b_ho))
    return jnp.stack(outs, axis=1), jnp.stack(hids, axis=1)


if __name__ == "__main__":
    B, C, I, H = 2, 3, 16, 32   # batch, num_cells, input_size, hidden_size

    key = jax.random.PRNGKey(0)
    k_par, k_cur, k_hist, k_h0 = jax.random.split(key, 4)

    params = init_params(k_par, I, C, H)
    kernel_params = prepare_kernel_params(params)
    current = jax.random.normal(k_cur, (B, C, I), jnp.float32)
    history = jax.random.normal(k_hist, (B, 2, 4, I), jnp.float32)  # unused by forward
    init_hidden = jax.random.normal(k_h0, (B, H), jnp.float32)

    outputs, hiddens = enhancer_forward(current, history, init_hidden, kernel_params)
    outputs = jax.block_until_ready(outputs)
    hiddens = jax.block_until_ready(hiddens)

    with jax.default_matmul_precision("highest"):
        ref_out, ref_hid = enhancer_reference(current, init_hidden, params)

    assert outputs.shape == (B, C, I) and hiddens.shape == (B, C, H)
    # Tolerance accommodates possible bf16-pass decomposition of f32 MXU dots.
    assert jnp.allclose(outputs, ref_out, atol=1e-3, rtol=1e-3)
    assert jnp.allclose(hiddens, ref_hid, atol=1e-3, rtol=1e-3)

    print("KERNEL_OK")
</pallas_src>

<mosaic_0001>
module attributes {stable_mosaic.version = 11 : i64} {
  func.func @enhancer_kernel(%arg0: memref<2x48xf32, #tpu.memory_space<vmem>>, %arg1: memref<2x32xf32, #tpu.memory_space<vmem>>, %arg2: memref<48x384xf32, #tpu.memory_space<vmem>>, %arg3: memref<1x384xf32, #tpu.memory_space<vmem>>, %arg4: memref<3x32x96xf32, #tpu.memory_space<vmem>>, %arg5: memref<3x1x32xf32, #tpu.memory_space<vmem>>, %arg6: memref<32x16xf32, #tpu.memory_space<vmem>>, %arg7: memref<1x16xf32, #tpu.memory_space<vmem>>, %arg8: memref<6x32xf32, #tpu.memory_space<vmem>>, %arg9: memref<6x16xf32, #tpu.memory_space<vmem>>, %arg10: memref<6x32xf32, #tpu.memory_space<vmem>>) attributes {dimension_semantics = [], scalar_prefetch = 0 : i64, scratch_operands = 1 : i64, tpu.core_type = #tpu.core_type<tc>} {
    %c0 = arith.constant 0 : index
    %c0_0 = arith.constant 0 : index
    %0 = vector.load %arg0[%c0, %c0_0] : memref<2x48xf32, #tpu.memory_space<vmem>>, vector<2x48xf32>
    %c0_1 = arith.constant 0 : index
    %c0_2 = arith.constant 0 : index
    %1 = vector.load %arg2[%c0_1, %c0_2] : memref<48x384xf32, #tpu.memory_space<vmem>>, vector<48x384xf32>
    %cst = arith.constant dense<0.000000e+00> : vector<2x384xf32>
    %2 = tpu.matmul %0, %1, %cst {dimension_numbers = #tpu.dot_dimension_numbers<[1], [0], [0], [1], [0, 0, 1, 1], [], []>} : vector<2x48xf32>, vector<48x384xf32>, vector<2x384xf32> -> vector<2x384xf32>
    %c0_3 = arith.constant 0 : index
    %c0_4 = arith.constant 0 : index
    %3 = vector.load %arg3[%c0_3, %c0_4] : memref<1x384xf32, #tpu.memory_space<vmem>>, vector<1x384xf32>
    %4 = vector.broadcast %3 : vector<1x384xf32> to vector<2x384xf32>
    %5 = arith.addf %2, %4 : vector<2x384xf32>
    %c0_5 = arith.constant 0 : index
    %c0_6 = arith.constant 0 : index
    %6 = vector.load %arg1[%c0_5, %c0_6] : memref<2x32xf32, #tpu.memory_space<vmem>>, vector<2x32xf32>
    %c0_7 = arith.constant 0 : index
    %c0_8 = arith.constant 0 : index
    %c0_9 = arith.constant 0 : index
    %7 = vector.load %arg4[%c0_7, %c0_8, %c0_9] : memref<3x32x96xf32, #tpu.memory_space<vmem>>, vector<1x32x96xf32>
    %8 = vector.shape_cast %7 : vector<1x32x96xf32> to vector<32x96xf32>
    %cst_10 = arith.constant dense<0.000000e+00> : vector<2x96xf32>
    %9 = tpu.matmul %6, %8, %cst_10 {dimension_numbers = #tpu.dot_dimension_numbers<[1], [0], [0], [1], [0, 0, 1, 1], [], []>} : vector<2x32xf32>, vector<32x96xf32>, vector<2x96xf32> -> vector<2x96xf32>
    %10 = vector.extract_strided_slice %5 {offsets = [0, 0], sizes = [2, 64], strides = [1, 1]} : vector<2x384xf32> to vector<2x64xf32>
    %11 = vector.extract_strided_slice %9 {offsets = [0, 0], sizes = [2, 64], strides = [1, 1]} : vector<2x96xf32> to vector<2x64xf32>
    %12 = arith.addf %10, %11 : vector<2x64xf32>
    %13 = arith.negf %12 : vector<2x64xf32>
    %14 = math.exp %13 : vector<2x64xf32>
    %cst_11 = arith.constant 1.000000e+00 : f32
    %15 = vector.broadcast %cst_11 : f32 to vector<2x64xf32>
    %16 = arith.addf %15, %14 : vector<2x64xf32>
    %17 = arith.divf %15, %16 : vector<2x64xf32>
    %18 = vector.extract_strided_slice %17 {offsets = [0, 0], sizes = [2, 32], strides = [1, 1]} : vector<2x64xf32> to vector<2x32xf32>
    %19 = vector.extract_strided_slice %17 {offsets = [0, 32], sizes = [2, 32], strides = [1, 1]} : vector<2x64xf32> to vector<2x32xf32>
    %20 = vector.extract_strided_slice %5 {offsets = [0, 64], sizes = [2, 32], strides = [1, 1]} : vector<2x384xf32> to vector<2x32xf32>
    %21 = vector.extract_strided_slice %9 {offsets = [0, 64], sizes = [2, 32], strides = [1, 1]} : vector<2x96xf32> to vector<2x32xf32>
    %c0_12 = arith.constant 0 : index
    %c0_13 = arith.constant 0 : index
    %c0_14 = arith.constant 0 : index
    %22 = vector.load %arg5[%c0_12, %c0_13, %c0_14] : memref<3x1x32xf32, #tpu.memory_space<vmem>>, vector<1x1x32xf32>
    %23 = vector.shape_cast %22 : vector<1x1x32xf32> to vector<1x32xf32>
    %24 = vector.broadcast %23 : vector<1x32xf32> to vector<2x32xf32>
    %25 = arith.addf %21, %24 : vector<2x32xf32>
    %26 = arith.mulf %18, %25 : vector<2x32xf32>
    %27 = arith.addf %20, %26 : vector<2x32xf32>
    %28 = math.tanh %27 : vector<2x32xf32>
    %cst_15 = arith.constant 1.000000e+00 : f32
    %29 = vector.broadcast %cst_15 : f32 to vector<2x32xf32>
    %30 = arith.subf %29, %19 : vector<2x32xf32>
    %31 = arith.mulf %30, %28 : vector<2x32xf32>
    %32 = arith.mulf %19, %6 : vector<2x32xf32>
    %33 = arith.addf %31, %32 : vector<2x32xf32>
    %c0_16 = arith.constant 0 : index
    %c0_17 = arith.constant 0 : index
    %34 = vector.load %arg10[%c0_16, %c0_17] : memref<6x32xf32, #tpu.memory_space<vmem>>, vector<2x32xf32>
    tpu.vector_store %arg10[%c0_16, %c0_17], %33 {strides = array<i32>} : memref<6x32xf32, #tpu.memory_space<vmem>>, vector<2x32xf32>,
    %c1 = arith.constant 1 : index
    %c0_18 = arith.constant 0 : index
    %c0_19 = arith.constant 0 : index
    %35 = vector.load %arg4[%c1, %c0_18, %c0_19] : memref<3x32x96xf32, #tpu.memory_space<vmem>>, vector<1x32x96xf32>
    %36 = vector.shape_cast %35 : vector<1x32x96xf32> to vector<32x96xf32>
    %cst_20 = arith.constant dense<0.000000e+00> : vector<2x96xf32>
    %37 = tpu.matmul %33, %36, %cst_20 {dimension_numbers = #tpu.dot_dimension_numbers<[1], [0], [0], [1], [0, 0, 1, 1], [], []>} : vector<2x32xf32>, vector<32x96xf32>, vector<2x96xf32> -> vector<2x96xf32>
    %38 = vector.extract_strided_slice %5 {offsets = [0, 128], sizes = [2, 64], strides = [1, 1]} : vector<2x384xf32> to vector<2x64xf32>
    %39 = vector.extract_strided_slice %37 {offsets = [0, 0], sizes = [2, 64], strides = [1, 1]} : vector<2x96xf32> to vector<2x64xf32>
    %40 = arith.addf %38, %39 : vector<2x64xf32>
    %41 = arith.negf %40 : vector<2x64xf32>
    %42 = math.exp %41 : vector<2x64xf32>
    %cst_21 = arith.constant 1.000000e+00 : f32
    %43 = vector.broadcast %cst_21 : f32 to vector<2x64xf32>
    %44 = arith.addf %43, %42 : vector<2x64xf32>
    %45 = arith.divf %43, %44 : vector<2x64xf32>
    %46 = vector.extract_strided_slice %45 {offsets = [0, 0], sizes = [2, 32], strides = [1, 1]} : vector<2x64xf32> to vector<2x32xf32>
    %47 = vector.extract_strided_slice %45 {offsets = [0, 32], sizes = [2, 32], strides = [1, 1]} : vector<2x64xf32> to vector<2x32xf32>
    %48 = vector.extract_strided_slice %5 {offsets = [0, 192], sizes = [2, 32], strides = [1, 1]} : vector<2x384xf32> to vector<2x32xf32>
    %49 = vector.extract_strided_slice %37 {offsets = [0, 64], sizes = [2, 32], strides = [1, 1]} : vector<2x96xf32> to vector<2x32xf32>
    %c1_22 = arith.constant 1 : index
    %c0_23 = arith.constant 0 : index
    %c0_24 = arith.constant 0 : index
    %50 = vector.load %arg5[%c1_22, %c0_23, %c0_24] : memref<3x1x32xf32, #tpu.memory_space<vmem>>, vector<1x1x32xf32>
    %51 = vector.shape_cast %50 : vector<1x1x32xf32> to vector<1x32xf32>
    %52 = vector.broadcast %51 : vector<1x32xf32> to vector<2x32xf32>
    %53 = arith.addf %49, %52 : vector<2x32xf32>
    %54 = arith.mulf %46, %53 : vector<2x32xf32>
    %55 = arith.addf %48, %54 : vector<2x32xf32>
    %56 = math.tanh %55 : vector<2x32xf32>
    %cst_25 = arith.constant 1.000000e+00 : f32
    %57 = vector.broadcast %cst_25 : f32 to vector<2x32xf32>
    %58 = arith.subf %57, %47 : vector<2x32xf32>
    %59 = arith.mulf %58, %56 : vector<2x32xf32>
    %60 = arith.mulf %47, %33 : vector<2x32xf32>
    %61 = arith.addf %59, %60 : vector<2x32xf32>
    %c2 = arith.constant 2 : index
    %c0_26 = arith.constant 0 : index
    %62 = vector.load %arg10[%c2, %c0_26] : memref<6x32xf32, #tpu.memory_space<vmem>>, vector<2x32xf32>
    tpu.vector_store %arg10[%c2, %c0_26], %61 {strides = array<i32>} : memref<6x32xf32, #tpu.memory_space<vmem>>, vector<2x32xf32>,
    %c2_27 = arith.constant 2 : index
    %c0_28 = arith.constant 0 : index
    %c0_29 = arith.constant 0 : index
    %63 = vector.load %arg4[%c2_27, %c0_28, %c0_29] : memref<3x32x96xf32, #tpu.memory_space<vmem>>, vector<1x32x96xf32>
    %64 = vector.shape_cast %63 : vector<1x32x96xf32> to vector<32x96xf32>
    %cst_30 = arith.constant dense<0.000000e+00> : vector<2x96xf32>
    %65 = tpu.matmul %61, %64, %cst_30 {dimension_numbers = #tpu.dot_dimension_numbers<[1], [0], [0], [1], [0, 0, 1, 1], [], []>} : vector<2x32xf32>, vector<32x96xf32>, vector<2x96xf32> -> vector<2x96xf32>
    %66 = vector.extract_strided_slice %5 {offsets = [0, 256], sizes = [2, 64], strides = [1, 1]} : vector<2x384xf32> to vector<2x64xf32>
    %67 = vector.extract_strided_slice %65 {offsets = [0, 0], sizes = [2, 64], strides = [1, 1]} : vector<2x96xf32> to vector<2x64xf32>
    %68 = arith.addf %66, %67 : vector<2x64xf32>
    %69 = arith.negf %68 : vector<2x64xf32>
    %70 = math.exp %69 : vector<2x64xf32>
    %cst_31 = arith.constant 1.000000e+00 : f32
    %71 = vector.broadcast %cst_31 : f32 to vector<2x64xf32>
    %72 = arith.addf %71, %70 : vector<2x64xf32>
    %73 = arith.divf %71, %72 : vector<2x64xf32>
    %74 = vector.extract_strided_slice %73 {offsets = [0, 0], sizes = [2, 32], strides = [1, 1]} : vector<2x64xf32> to vector<2x32xf32>
    %75 = vector.extract_strided_slice %73 {offsets = [0, 32], sizes = [2, 32], strides = [1, 1]} : vector<2x64xf32> to vector<2x32xf32>
    %76 = vector.extract_strided_slice %5 {offsets = [0, 320], sizes = [2, 32], strides = [1, 1]} : vector<2x384xf32> to vector<2x32xf32>
    %77 = vector.extract_strided_slice %65 {offsets = [0, 64], sizes = [2, 32], strides = [1, 1]} : vector<2x96xf32> to vector<2x32xf32>
    %c2_32 = arith.constant 2 : index
    %c0_33 = arith.constant 0 : index
    %c0_34 = arith.constant 0 : index
    %78 = vector.load %arg5[%c2_32, %c0_33, %c0_34] : memref<3x1x32xf32, #tpu.memory_space<vmem>>, vector<1x1x32xf32>
    %79 = vector.shape_cast %78 : vector<1x1x32xf32> to vector<1x32xf32>
    %80 = vector.broadcast %79 : vector<1x32xf32> to vector<2x32xf32>
    %81 = arith.addf %77, %80 : vector<2x32xf32>
    %82 = arith.mulf %74, %81 : vector<2x32xf32>
    %83 = arith.addf %76, %82 : vector<2x32xf32>
    %84 = math.tanh %83 : vector<2x32xf32>
    %cst_35 = arith.constant 1.000000e+00 : f32
    %85 = vector.broadcast %cst_35 : f32 to vector<2x32xf32>
    %86 = arith.subf %85, %75 : vector<2x32xf32>
    %87 = arith.mulf %86, %84 : vector<2x32xf32>
    %88 = arith.mulf %75, %61 : vector<2x32xf32>
    %89 = arith.addf %87, %88 : vector<2x32xf32>
    %c4 = arith.constant 4 : index
    %c0_36 = arith.constant 0 : index
    %90 = vector.load %arg10[%c4, %c0_36] : memref<6x32xf32, #tpu.memory_space<vmem>>, vector<2x32xf32>
    tpu.vector_store %arg10[%c4, %c0_36], %89 {strides = array<i32>} : memref<6x32xf32, #tpu.memory_space<vmem>>, vector<2x32xf32>,
    %c0_37 = arith.constant 0 : index
    %c0_38 = arith.constant 0 : index
    %91 = vector.load %arg10[%c0_37, %c0_38] : memref<6x32xf32, #tpu.memory_space<vmem>>, vector<6x32xf32>
    %c0_39 = arith.constant 0 : index
    %c0_40 = arith.constant 0 : index
    %92 = vector.load %arg8[%c0_39, %c0_40] : memref<6x32xf32, #tpu.memory_space<vmem>>, vector<6x32xf32>
    tpu.vector_store %arg8[%c0_39, %c0_40], %91 {strides = array<i32>} : memref<6x32xf32, #tpu.memory_space<vmem>>, vector<6x32xf32>,
    %c0_41 = arith.constant 0 : index
    %c0_42 = arith.constant 0 : index
    %93 = vector.load %arg10[%c0_41, %c0_42] : memref<6x32xf32, #tpu.memory_space<vmem>>, vector<6x32xf32>
    %c0_43 = arith.constant 0 : index
    %c0_44 = arith.constant 0 : index
    %94 = vector.load %arg6[%c0_43, %c0_44] : memref<32x16xf32, #tpu.memory_space<vmem>>, vector<32x16xf32>
    %cst_45 = arith.constant dense<0.000000e+00> : vector<6x16xf32>
    %95 = tpu.matmul %93, %94, %cst_45 {dimension_numbers = #tpu.dot_dimension_numbers<[1], [0], [0], [1], [0, 0, 1, 1], [], []>} : vector<6x32xf32>, vector<32x16xf32>, vector<6x16xf32> -> vector<6x16xf32>
    %c0_46 = arith.constant 0 : index
    %c0_47 = arith.constant 0 : index
    %96 = vector.load %arg7[%c0_46, %c0_47] : memref<1x16xf32, #tpu.memory_space<vmem>>, vector<1x16xf32>
    %97 = vector.broadcast %96 : vector<1x16xf32> to vector<6x16xf32>
    %98 = arith.addf %95, %97 : vector<6x16xf32>
    %99 = math.tanh %98 : vector<6x16xf32>
    %c0_48 = arith.constant 0 : index
    %c0_49 = arith.constant 0 : index
    %100 = vector.load %arg9[%c0_48, %c0_49] : memref<6x16xf32, #tpu.memory_space<vmem>>, vector<6x16xf32>
    tpu.vector_store %arg9[%c0_48, %c0_49], %99 {strides = array<i32>} : memref<6x16xf32, #tpu.memory_space<vmem>>, vector<6x16xf32>,
    return
  }
}

</mosaic_0001>

<bundles_post_ra>
// kernel: enhancer_forward.1
= control target key start
LH: loop header
LB: loop body
LE: loop exit
PB: predicated region body
PF: predicated region fallthrough
CT: control target
= control target key end

     0   :  { %15 = vsyncpa [#allocation4], 0  ;;  %s1059_s0 = inlined_call_operand.vmem [shape: f32[2,48], index: 0, kind: input, shape index: {}]   ;;  %s1060_s1 = inlined_call_operand.vmem [shape: f32[2,32], index: 1, kind: input, shape index: {}]   ;;  %s1061_s2 = inlined_call_operand.hbm [shape: f32[48,384], index: 2, kind: input, shape index: {}]   ;;  %s1062_s3 = inlined_call_operand.vmem [shape: f32[1,384], index: 3, kind: input, shape index: {}]   ;;  %s1063_s4 = inlined_call_operand.hbm [shape: f32[3,32,96], index: 4, kind: input, shape index: {}]   ;;  %s1064_s5 = inlined_call_operand.vmem [shape: f32[3,1,32], index: 5, kind: input, shape index: {}]   ;;  %s1065_s6 = inlined_call_operand.vmem [shape: f32[32,16], index: 6, kind: input, shape index: {}]   ;;  %s1066_s7 = inlined_call_operand.vmem [shape: f32[1,16], index: 7, kind: input, shape index: {}]   ;;  %s1067_s8 = inlined_call_operand.vmem [shape: f32[6,32], index: 8, kind: output, shape index: {0}]   ;;  %s1068_s9 = inlined_call_operand.vmem [shape: f32[6,16], index: 9, kind: output, shape index: {1}]  }
   0x1   :  { %16 = vsyncpa [#allocation6], 0  ;;  %s879_s30 = smov [#allocation3]  }
   0x2   :  { %s26_s10 = sshll.u32 %s879_s30, 4  ;;  %s27_s10 = int_to_ptr.vmem [resolvable:$true] %s26_s10 }
   0x3   :  { %s843_s11 = scalar_lea.vmem %s27_s10, 2304  ;;  %p848_p1 = scmp.lt.s32.totalorder %s27_s10, %s27_s10 }
   0x4   :  { %p844_p0 = scmp.ne.s32.totalorder %s27_s10, %s843_s11  ;;  %p849_p2 = scmp.lt.s32.totalorder %s843_s11, %s843_s11 }
   0x6   :  { %p850_p3 = por %p849_p2, %p848_p1 }
   0x8   :  { %p851_p4 = pnand %p850_p3, %p844_p0 }
   0xa   :  { %854 = shalt.err (!%p851_p4)
}
   0xb   :  { %s880_s12 = smov 384   ;;  %s881_s13 = smov 24  }
   0xc   :  { %32 = dma.hbm_to_vmem [thread:$0]  %s1061_s2, 2304, %s27_s10, [#allocation4], %s880_s12, %s880_s12, %s881_s13  }
   0xd   :  { %s882_s16 = smov [#allocation5]  }
   0xe   :  { %s40_s17 = sshll.u32 %s882_s16, 4  ;;  %s41_s17 = int_to_ptr.vmem [resolvable:$true] %s40_s17 }
   0xf   :  { %s863_s18 = scalar_lea.vmem %s41_s17, 1536  ;;  %p868_p6 = scmp.lt.s32.totalorder %s41_s17, %s41_s17 }
  0x10   :  { %p864_p5 = scmp.ne.s32.totalorder %s41_s17, %s863_s18  ;;  %p869_p7 = scmp.lt.s32.totalorder %s863_s18, %s863_s18 }
  0x12   :  { %p870_p8 = por %p869_p7, %p868_p6 }
  0x14   :  { %p871_p9 = pnand %p870_p8, %p864_p5 }
  0x16   :  { %874 = shalt.err (!%p871_p9)
}
  0x17   :  { %s883_s19 = smov 128   ;;  %s884_s20 = smov 8  }
  0x18   :  { %46 = dma.hbm_to_vmem [thread:$0]  %s1063_s4, 1536, %s41_s17, [#allocation6], %s883_s19, %s883_s19, %s884_s20  }
  0x19   :  { %875 = dma.done.wait [#allocation4], 2304  }
  0x1a   :  { %876 = vsyncadd [#allocation4], 4294964992 }
  0x1b   :  { %877 = dma.done.wait [#allocation6], 1536  }
  0x1c   :  { %878 = vsyncadd [#allocation6], 4294965760  ;;  %v885_v0 = vmov 0.0   ;;  %vm886_vm0 = vmmov 0   ;;  %v76_v1 = vld [vmem:[#allocation3 + $0x80] sm:$0xff]  ;;  %v75_v2 = vld [vmem:[#allocation3 + $0x78] sm:$0xff]  ;;  %v80_v26 = vlaneseq }
  0x1d   :  { %163 = vmatprep.mubr.f32.mxu0 %v885_v0  ;;  %745 = vmatprep.subr.mxu1 %v885_v0  ;;  %v73_v3 = vld [vmem:[#allocation3 + $0x68] sm:$0xff]  ;;  %v72_v4 = vld [vmem:[#allocation3 + $0x60] sm:$0xff]  ;;  %v70_v5 = vld [vmem:[#allocation3 + $0x50] sm:$0xff]  ;;  %s887_s23 = smov 64   ;;  %vm95_vm1 = vcmask 392192   ;;  %vm245_vm2 = vcmask 261120  }
  0x1e   :  { %757 = vmatprep.mubr.msk.f32.mxu1 %vm886_vm0, %v885_v0  ;;  %119 = vmatprep.subr.mxu0 %v76_v1  ;;  %v69_v6 = vld [vmem:[#allocation3 + $0x48] sm:$0xff]  ;;  %v67_v7 = vld [vmem:[#allocation3 + $0x38] sm:$0xff]  ;;  %v66_v8 = vld [vmem:[#allocation3 + $0x30] sm:$0xff]  ;;  %v977_v27 = vshrl.u32 %v80_v26, 7  ;;  %vm362_vm3 = vcmask 254976   ;;  %vm603_vm4 = vcmask 259072  }
  0x1f   :  { %120 = vmatpush1.msra.mxu0 %v75_v2  ;;  %v64_v9 = vld [vmem:[#allocation3 + $0x20] sm:$0xff]  ;;  %v707_v10 = vld [vmem:[%s1064_s5] ss:$0 sm:$0xff]  ;;  %v61_v12 = vld [vmem:[#allocation3 + $0x8] sm:$0xff]  ;;  %vm691_vm5 = vcmask 128000  }
  0x20   :  { %121 = vmatprep.subr.mxu0 %v73_v3  ;;  %v63_v11 = vld [vmem:[#allocation3 + $0x18] sm:$0xff]  ;;  %332 = vrot.lane.b32.xlu0 %v707_v10, %s887_s23  ;;  %v60_v13 = vld [vmem:[#allocation3] sm:$0xff]  ;;  %v244_v15 = vld [vmem:[#allocation5 + $0x18] sm:$0xff]  ;;  %v82_v28 = vsub.s32 0, %v977_v27  ;;  %v86_v3 = vsub.s32 1, %v977_v27 }
  0x21   :  { %122 = vmatpush1.msra.mxu0 %v72_v4  ;;  %v957_v14 = vld [vmem:[%s1059_s0] sm:$0x3]  ;;  %v243_v16 = vld [vmem:[#allocation5 + $0x10] sm:$0xff]  ;;  %v241_v18 = vld [vmem:[#allocation5] sm:$0xff] }
  0x22   :  { %123 = vmatprep.subr.mxu0 %v70_v5  ;;  %v242_v17 = vld [vmem:[#allocation5 + $0x8] sm:$0xff]  ;;  %v77_v41 = vld [vmem:[#allocation3 + $0x88] sm:$0xff]  ;;  %v74_v42 = vld [vmem:[#allocation3 + $0x70] sm:$0xff] }
  0x23   :  { %124 = vmatpush1.msra.mxu0 %v69_v6  ;;  %v240_v19 = vld [vmem:[%s1060_s1] sm:$0x3]  ;;  %s888_s1 = smov 32   ;;  %746 = vmatpush3.msra.mxu1 %v77_v41  ;;  %v68_v44 = vld [vmem:[#allocation3 + $0x40] sm:$0xff]  ;;  %v65_v45 = vld [vmem:[#allocation3 + $0x28] sm:$0xff] }
  0x24   :  { %125 = vmatprep.subr.mxu0 %v67_v7  ;;  %v983_v29 = vld [vmem:[%s1062_s3] sm:$0x7]  ;;  %747 = vmatprep.subr.mxu1 %v885_v0  ;;  %v62_v47 = vld [vmem:[#allocation3 + $0x10] sm:$0xff]  ;;  %s889_s3 = smov 96   ;;  %v368_v48 = vld [vmem:[#allocation5 + $0x38] sm:$0xff] }
  0x25   :  { %126 = vmatpush1.msra.mxu0 %v66_v8  ;;  %v83_v30 = vrot.slane %v983_v29, %v82_v28  ;;  %v71_v43 = vld [vmem:[#allocation3 + $0x58] sm:$0xff]  ;;  %748 = vmatpush3.msra.mxu1 %v74_v42  ;;  %v367_v49 = vld [vmem:[#allocation5 + $0x30] sm:$0xff]  ;;  %v365_v51 = vld [vmem:[#allocation5 + $0x20] sm:$0xff]  ;;  %v87_v4 = vrot.slane %v983_v29, %v86_v3 }
  0x26   :  { %127 = vmatprep.subr.mxu0 %v64_v9  ;;  %749 = vmatprep.subr.mxu1 %v885_v0  ;;  %v366_v50 = vld [vmem:[#allocation5 + $0x28] sm:$0xff] }
  0x27   :  { %128 = vmatpush1.msra.mxu0 %v63_v11  ;;  %750 = vmatpush3.msra.mxu1 %v71_v43  ;;  %v711_v52 = vld [vmem:[%s1064_s5 + $0x1] ss:$0 sm:$0xff] }
  0x28   :  { %129 = vmatprep.subr.mxu0 %v61_v12  ;;  %751 = vmatprep.subr.mxu1 %v885_v0 }
  0x29   :  { %130 = vmatpush1.msra.mxu0 %v60_v13  ;;  %752 = vmatpush3.msra.mxu1 %v68_v44 }
  0x2a   :  { %703 = vmatmul.mubr.msk.f32.vlgmr.msra.gmra.mxu0 %vm95_vm1, %v957_v14  ;;  %760 = vmatprep.subr.mxu0 %v885_v0 }
  0x2b   :  { %761 = vmatpush3.msra.mxu0 %v244_v15  ;;  %768 = vmatprep.mubr.msk.f32.mxu0 %vm886_vm0, %v885_v0  ;;  %v487_v15 = vld [vmem:[#allocation5 + $0x58] sm:$0xff] }
  0x2c   :  { %762 = vmatprep.subr.mxu0 %v885_v0  ;;  %753 = vmatprep.subr.mxu1 %v885_v0 }
  0x2d   :  { %763 = vmatpush3.msra.mxu0 %v243_v16  ;;  %754 = vmatpush3.msra.mxu1 %v65_v45  ;;  %v486_v16 = vld [vmem:[#allocation5 + $0x50] sm:$0xff] }
  0x2e   :  { %764 = vmatprep.subr.mxu0 %v885_v0  ;;  %755 = vmatprep.subr.mxu1 %v885_v0 }
  0x2f   :  { %765 = vmatpush3.msra.mxu0 %v242_v17  ;;  %756 = vmatpush3.msra.mxu1 %v62_v47  ;;  %v485_v17 = vld [vmem:[#allocation5 + $0x48] sm:$0xff] }
  0x30   :  { %766 = vmatprep.subr.mxu0 %v885_v0  ;;  %758 = vmatmul.mubr.msk.f32.vlgmr.msra.gmra.mxu1 %vm95_vm1, %v957_v14  ;;  %v606_v47 = vld [vmem:[%s1065_s6] sm:$0xff] }
  0x31   :  { %767 = vmatpush3.msra.mxu0 %v241_v18  ;;  %771 = vmatprep.subr.mxu1 %v885_v0  ;;  %v484_v18 = vld [vmem:[#allocation5 + $0x40] sm:$0xff] }
  0x32   :  { %769 = vmatmul.mubr.msk.f32.vlgmr.msra.gmra.mxu0 %vm245_vm2, %v240_v19  ;;  %782 = vmatprep.subr.mxu0 %v885_v0 }
  0x33   :  { %790 = vmatprep.mubr.msk.f32.mxu0 %vm886_vm0, %v885_v0  ;;  %772 = vmatpush3.msra.mxu1 %v368_v48 }
  0x34   :  { %779 = vmatprep.mubr.msk.f32.mxu1 %vm886_vm0, %v885_v0  ;;  %773 = vmatprep.subr.mxu1 %v885_v0 }
  0x35   :  { %774 = vmatpush3.msra.mxu1 %v367_v49  ;;  %783 = vmatpush3.msra.mxu0 %v487_v15 }
  0x36   :  { %775 = vmatprep.subr.mxu1 %v885_v0  ;;  %784 = vmatprep.subr.mxu0 %v885_v0 }
  0x37   :  { %776 = vmatpush3.msra.mxu1 %v366_v50  ;;  %785 = vmatpush3.msra.mxu0 %v486_v16 }
  0x38   :  { %777 = vmatprep.subr.mxu1 %v885_v0  ;;  %786 = vmatprep.subr.mxu0 %v885_v0 }
  0x39   :  { %778 = vmatpush3.msra.mxu1 %v365_v51  ;;  %787 = vmatpush3.msra.mxu0 %v485_v17 }
  0x3a   :  { %793 = vmatprep.subr.mxu1 %v885_v0  ;;  %788 = vmatprep.subr.mxu0 %v885_v0 }
  0x3b   :  { %789 = vmatpush3.msra.mxu0 %v484_v18 }
  0x92   :  { %v333_v22 = vpop.permute.xlu0 %332 }
  0xea   :  { %v165_v20 = vpop.f32.mrf.mxu0 }
  0xeb   :  { %v166_v31 = vadd.f32 %v165_v20, %v83_v30  ;;  %v715_v20 = vld [vmem:[%s1064_s5 + $0x2] ss:$0 sm:$0xff] }
  0xec   :  { %v974_v21 = vpop.f32.mrf.mxu0 }
  0xed   :  { %v168_v5 = vadd.f32 %v974_v21, %v87_v4 }
  0xf0   :  { %v236_v59 = vpop.f32.mrf.mxu1 }
  0xf2   :  { %v315_v23 = vpop.f32.mrf.mxu0  ;;  %v759_v60 = vpop.f32.mrf.mxu1 }
  0xf3   :  { %v335_v24 = vadd.f32 %v333_v22, %v315_v23  ;;  %v319_v32 = vadd.f32 %v315_v23, %v166_v31 }
  0xf4   :  { %v770_v25 = vpop.f32.mrf.mxu0 }
  0xf5   :  { %337 = vrot.lane.b32.xlu0 %v335_v24, %s887_s23  ;;  %v706_v33 = vmul.f32 -1.442695, %v319_v32 }
  0xf7   :  { %815 = vpow2.f32 %v706_v33  ;;  %v90_v33 = vsub.s32 2, %v977_v27  ;;  %v609_v27 = vld [vmem:[%s1065_s6 + $0x18] sm:$0xff] }
  0xf9   :  { %353 = vrot.lane.b32.xlu0 %v240_v19, %s888_s1 }
  0xfd   :  { %455 = vrot.lane.b32.xlu0 %v711_v52, %s887_s23 }
 0x104   :  { %v816_v34 = vpop.eup %815 }
 0x105   :  { %v323_v35 = vadd.f32 1.0, %v816_v34  ;;  %v91_v34 = vrot.slane %v983_v29, %v90_v33  ;;  %v608_v29 = vld [vmem:[%s1065_s6 + $0x10] sm:$0xff] }
 0x107   :  { %817 = vrcp.f32 %v323_v35  ;;  %v237_v35 = vadd.f32 %v236_v59, %v91_v34 }
 0x114   :  { %v818_v36 = vpop.eup %817 }
 0x115   :  { %v347_v54 = vsub.f32 1.0, %v818_v36 }
 0x167   :  { %v338_v37 = vpop.permute.xlu0 %337 }
 0x168   :  { %v340_v38 = vmul.f32 %v818_v36, %v338_v37 }
 0x16a   :  { %342 = vrot.lane.b32.xlu1 %v340_v38, %s887_s23 }
 0x16b   :  { %v354_v53 = vpop.permute.xlu0 %353 }
 0x16c   :  { %v356_v56 = vmul.f32 %v818_v36, %v354_v53 }
 0x16f   :  { %v456_v62 = vpop.permute.xlu0 %455 }
 0x1dc   :  { %v343_v39 = vpop.permute.xlu1 %342 }
 0x1dd   :  { %v345_v40 = vadd.f32 %v343_v39, %v166_v31 }
 0x1df   :  { %819 = vtanh.f32 %v345_v40 }
 0x1ec   :  { %v820_v46 = vpop.eup %819 }
 0x1ed   :  { %349 = vrot.lane.b32.xlu1 %v820_v46, %s889_s3  ;;  %v607_v46 = vld [vmem:[%s1065_s6 + $0x8] sm:$0xff] }
 0x25f   :  { %v350_v55 = vpop.permute.xlu1 %349 }
 0x260   :  { %v352_v57 = vmul.f32 %v350_v55, %v347_v54 }
 0x262   :  { %v357_v58 = vadd.f32 %v356_v56, %v352_v57 }
 0x264   :  { %359 = vrot.lane.b32.xlu1 %v357_v58, %s889_s3 }
 0x2d6   :  { %v360_v61 = vpop.permute.xlu1 %359 }
 0x2d7   :  { %363 = vst.msk [vmem:[#allocation2] sm:$0x3] %vm362_vm3, %v360_v61  ;;  %780 = vmatmul.mubr.msk.f32.vlgmr.msra.gmra.mxu1 %vm245_vm2, %v360_v61 }
 0x2d8   :  { %801 = vmatprep.mubr.msk.f32.mxu1 %vm886_vm0, %v885_v0  ;;  %794 = vmatpush3.msra.mxu1 %v609_v27 }
 0x2d9   :  { %795 = vmatprep.subr.mxu1 %v885_v0 }
 0x2da   :  { %796 = vmatpush3.msra.mxu1 %v608_v29 }
 0x2db   :  { %797 = vmatprep.subr.mxu1 %v885_v0 }
 0x2dc   :  { %798 = vmatpush3.msra.mxu1 %v607_v46 }
 0x2dd   :  { %799 = vmatprep.subr.mxu1 %v885_v0  ;;  %v716_v0 = vld [vmem:[%s1066_s7] ss:$0 sm:$0xff] }
 0x2de   :  { %800 = vmatpush3.msra.mxu1 %v606_v47 }
 0x397   :  { %v437_v63 = vpop.f32.mrf.mxu1 }
 0x398   :  { %v458_v1 = vadd.f32 %v456_v62, %v437_v63  ;;  %v441_v6 = vadd.f32 %v437_v63, %v168_v5 }
 0x399   :  { %v781_v2 = vpop.f32.mrf.mxu1 }
 0x39a   :  { %460 = vrot.lane.b32.xlu1 %v458_v1, %s887_s23  ;;  %v709_v7 = vmul.f32 -1.442695, %v441_v6 }
 0x39c   :  { %821 = vpow2.f32 %v709_v7 }
 0x3a9   :  { %v822_v8 = vpop.eup %821 }
 0x3aa   :  { %v445_v9 = vadd.f32 1.0, %v822_v8 }
 0x3ac   :  { %823 = vrcp.f32 %v445_v9 }
 0x3b9   :  { %v824_v10 = vpop.eup %823 }
 0x3ba   :  { %v470_v21 = vsub.f32 1.0, %v824_v10  ;;  %v476_v23 = vmul.f32 %v824_v10, %v357_v58 }
 0x40c   :  { %v461_v11 = vpop.permute.xlu1 %460 }
 0x40d   :  { %v463_v12 = vmul.f32 %v824_v10, %v461_v11 }
 0x40f   :  { %465 = vrot.lane.b32.xlu0 %v463_v12, %s887_s23 }
 0x481   :  { %v466_v13 = vpop.permute.xlu0 %465 }
 0x482   :  { %v468_v14 = vadd.f32 %v466_v13, %v168_v5 }
 0x484   :  { %825 = vtanh.f32 %v468_v14 }
 0x491   :  { %v826_v19 = vpop.eup %825 }
 0x492   :  { %472 = vrot.lane.b32.xlu1 %v826_v19, %s889_s3 }
 0x496   :  { %574 = vrot.lane.b32.xlu1 %v715_v20, %s887_s23 }
 0x504   :  { %v473_v22 = vpop.permute.xlu1 %472 }
 0x505   :  { %v475_v24 = vmul.f32 %v473_v22, %v470_v21 }
 0x507   :  { %v477_v25 = vadd.f32 %v476_v23, %v475_v24 }
 0x508   :  { %v575_v28 = vpop.permute.xlu1 %574 }
 0x509   :  { %479 = vrot.lane.b32.xlu0 %v477_v25, %s889_s3 }
 0x57b   :  { %v480_v26 = vpop.permute.xlu0 %479 }
 0x57c   :  { %482 = vst.msk [vmem:[#allocation2 + $0x2] sm:$0x3] %vm362_vm3, %v480_v26  ;;  %791 = vmatmul.mubr.msk.f32.vlgmr.msra.gmra.mxu0 %vm245_vm2, %v480_v26 }
 0x63c   :  { %v556_v30 = vpop.f32.mrf.mxu0 }
 0x63d   :  { %v577_v31 = vadd.f32 %v575_v28, %v556_v30  ;;  %v560_v36 = vadd.f32 %v556_v30, %v237_v35 }
 0x63e   :  { %v792_v32 = vpop.f32.mrf.mxu0 }
 0x63f   :  { %579 = vrot.lane.b32.xlu0 %v577_v31, %s887_s23  ;;  %v713_v37 = vmul.f32 -1.442695, %v560_v36 }
 0x641   :  { %827 = vpow2.f32 %v713_v37 }
 0x64e   :  { %v828_v38 = vpop.eup %827 }
 0x64f   :  { %v564_v39 = vadd.f32 1.0, %v828_v38 }
 0x651   :  { %829 = vrcp.f32 %v564_v39 }
 0x65e   :  { %v830_v40 = vpop.eup %829 }
 0x65f   :  { %v589_v48 = vsub.f32 1.0, %v830_v40  ;;  %v595_v50 = vmul.f32 %v830_v40, %v477_v25 }
 0x6b1   :  { %v580_v41 = vpop.permute.xlu0 %579 }
 0x6b2   :  { %v582_v42 = vmul.f32 %v830_v40, %v580_v41 }
 0x6b4   :  { %584 = vrot.lane.b32.xlu1 %v582_v42, %s887_s23 }
 0x726   :  { %v585_v43 = vpop.permute.xlu1 %584 }
 0x727   :  { %v587_v44 = vadd.f32 %v585_v43, %v237_v35 }
 0x729   :  { %831 = vtanh.f32 %v587_v44 }
 0x736   :  { %v832_v45 = vpop.eup %831 }
 0x737   :  { %591 = vrot.lane.b32.xlu0 %v832_v45, %s889_s3 }
 0x7a9   :  { %v592_v49 = vpop.permute.xlu0 %591 }
 0x7aa   :  { %v594_v51 = vmul.f32 %v592_v49, %v589_v48 }
 0x7ac   :  { %v596_v52 = vadd.f32 %v595_v50, %v594_v51 }
 0x7ae   :  { %598 = vrot.lane.b32.xlu1 %v596_v52, %s889_s3 }
 0x820   :  { %v599_v53 = vpop.permute.xlu1 %598 }
 0x821   :  { %601 = vst.msk [vmem:[#allocation2 + $0x4] sm:$0x3] %vm362_vm3, %v599_v53 }
 0x828   :  { %v602_v54 = vld [vmem:[#allocation2] sm:$0x3f] }
 0x829   :  { %v605_v55 = vld [vmem:[#allocation2] sm:$0x3f]  ;;  %604 = vst.msk [vmem:[%s1067_s8] sm:$0x3f] %vm603_vm4, %v602_v54 }
 0x82a   :  { %802 = vmatmul.mubr.msk.f32.vlgmr.msra.gmra.mxu1 %vm245_vm2, %v605_v55 }
 0x8ea   :  { %v686_v56 = vpop.f32.mrf.mxu1 }
 0x8eb   :  { %v687_v57 = vadd.f32 %v716_v0, %v686_v56 }
 0x8ec   :  { %v803_v58 = vpop.f32.mrf.mxu1 }
 0x8ed   :  { %833 = vtanh.f32 %v687_v57 }
 0x8fa   :  { %v834_v59 = vpop.eup %833 }
 0x8fb   :  { %692 = vst.msk [vmem:[%s1068_s9] sm:$0x3f] %vm691_vm5, %v834_v59 }
 0x8fc   :  { %701 = vsyncpa [#allocation4], 1 }
 0x8fd   :  { %702 = vsyncpa [#allocation6], 1 }

</bundles_post_ra>
